<compile_context>
chip_gen: v5e
topology: v5e:2x2
jax: 0.10.0
libtpu: 0.0.40
codegen_flags: <defaults>
</compile_context>

<pallas_src>
import functools

import jax
import jax.numpy as jnp
from jax import lax
from jax.experimental import pallas as pl
from jax.experimental.pallas import tpu as pltpu


def _round_up(x, m):
    return (x + m - 1) // m * m


_HALO = 128  # one lane-block of look-ahead per phase (covers kernels up to 128*stride+1)


def _sepconv1d_kernel(xm_ref, xh_ref, w2_ref, fb_ref, o_ref, *,
                      kernel, stride, lt, fuse_kc):
    # xm_ref : (S, C, LT)   phase-decomposed input tile (lane = output position)
    # xh_ref : (S, C, 128)  look-ahead (halo) lanes of the same phases
    # w2_ref : (NO, K*C)  if fuse_kc else (K, NO, C)   fused depthwise*pointwise weights
    # fb_ref : (NO, 1)      fused bias = pw_w @ dw_b + pw_b   (f32)
    # o_ref  : (NO, LT)     lane-dense output tile
    taps = []
    full = {}
    for k in range(kernel):
        p, d = k % stride, k // stride
        if d == 0:
            taps.append(xm_ref[p])
        else:
            if p not in full:
                full[p] = jnp.concatenate([xm_ref[p], xh_ref[p]], axis=-1)
            taps.append(full[p][:, d:d + lt])        # static lane-offset slice (XLU)

    if fuse_kc:
        # Aligned sublane stack (C % 8 == 0): one (NO, K*C) x (K*C, LT) MXU matmul.
        x2 = taps[0] if kernel == 1 else jnp.concatenate(taps, axis=0)
        out = jnp.dot(w2_ref[...], x2, preferred_element_type=jnp.float32)
    else:
        # C not sublane-aligned: accumulate K small matmuls (still no VPU tap loop,
        # no persistent (C, LT) f32 intermediate).
        out = jnp.dot(w2_ref[0], taps[0], preferred_element_type=jnp.float32)
        for k in range(1, kernel):
            out = out + jnp.dot(w2_ref[k], taps[k],
                                preferred_element_type=jnp.float32)

    # Bias add + ReLU in f32 (v5e has no bf16 VALUs).
    o_ref[...] = jnp.maximum(out + fb_ref[...], 0.0).astype(o_ref.dtype)


def _pick_tile(lp, batch, c, no, kernel, stride, itemsize):
    """Largest lane tile dividing lp that fits comfortably in scoped VMEM (with
    double buffering + temporaries) and leaves >=2 grid steps (v7x: 2 TCs/chip)."""
    budget = 4 * 1024 * 1024
    for cand in (4096, 2048, 1024, 512, 256, 128):
        if lp % cand:
            continue
        per_step = (stride * c * (cand + _HALO) + no * cand) * itemsize
        x2_tmp = kernel * c * cand * itemsize
        if 3 * per_step + x2_tmp > budget:
            continue
        if cand > 128 and batch * (lp // cand) < 2:
            continue
        return cand
    return 128


def sepconv1d(x, dw_w, dw_b, pw_w, pw_b, *, kernel, stride, pad,
              storage_dtype=jnp.bfloat16):
    """SepConv1d forward: depthwise conv1d + pointwise 1x1 conv + ReLU.

    x: (B, C, L); dw_w: (C, K); dw_b: (C,)/(C,1); pw_w: (NO, C); pw_b: (NO,)/(NO,1).
    Returns (B, NO, L_out) in x.dtype, L_out = (L + 2*pad - K)//stride + 1.
    storage_dtype: dtype for activations/weights in HBM and as MXU operands
    (accumulation always f32). Pass None for the exact same-as-input (f32) path.
    """
    b, c, l = x.shape
    dw_w = dw_w.reshape(c, kernel)
    dw_b = dw_b.reshape(c, 1)
    no = pw_w.shape[0]
    pw_w = pw_w.reshape(no, c)
    pw_b = pw_b.reshape(no, 1)

    assert kernel >= 1 and stride >= 1
    assert (kernel - 1) // stride <= _HALO, "kernel too large for one halo block"

    l_out = (l + 2 * pad - kernel) // stride + 1
    lp = _round_up(l_out, 128)                         # lane-dense output length
    op_dtype = storage_dtype if storage_dtype is not None else x.dtype
    itemsize = jnp.dtype(op_dtype).itemsize
    lt = _pick_tile(lp, b, c, no, kernel, stride, itemsize)
    n_tiles = lp // lt
    tpb = lt // 128                                    # 128-lane blocks per tile
    fuse_kc = (c % 8 == 0)

    # ---- wrapper prep: ONE pass over the input (no K-fold duplication) ----------
    # Pad so every tap of every (padded) output column exists, then de-interleave
    # the `stride` phases:  x_ph[p, b, c, j] = x_pad[b, c, j*stride + p].
    l_need = (lp + _HALO) * stride
    x_p = jnp.pad(x, ((0, 0), (0, 0), (pad, max(0, l_need - pad - l))))[:, :, :l_need]
    x_ph = x_p.reshape(b, c, lp + _HALO, stride).transpose(3, 0, 1, 2)
    x_ph = x_ph.astype(op_dtype)                       # (S, B, C, Lp+128)

    # Fold depthwise into the pointwise matmul (exact: both are linear).
    w23 = pw_w[:, None, :] * dw_w.T[None, :, :]        # (NO, K, C)
    if fuse_kc:
        w2 = w23.reshape(no, kernel * c).astype(op_dtype)
        w2_spec = pl.BlockSpec((no, kernel * c), lambda bi, j: (0, 0))
    else:
        w2 = w23.transpose(1, 0, 2).astype(op_dtype)   # (K, NO, C)
        w2_spec = pl.BlockSpec((kernel, no, c), lambda bi, j: (0, 0, 0))
    fb = (jnp.dot(pw_w.astype(jnp.float32), dw_b.astype(jnp.float32))
          + pw_b.astype(jnp.float32))                  # (NO, 1) f32

    kern = functools.partial(_sepconv1d_kernel, kernel=kernel, stride=stride,
                             lt=lt, fuse_kc=fuse_kc)

    flops = 2 * b * lp * kernel * c * no
    bytes_accessed = ((x_ph.size + b * n_tiles * stride * c * _HALO) * itemsize
                      + b * no * lp * jnp.dtype(x.dtype).itemsize
                      + w2.size * itemsize + fb.size * 4)

    out = pl.pallas_call(
        kern,
        out_shape=jax.ShapeDtypeStruct((b, no, lp), x.dtype),
        grid=(b, n_tiles),
        in_specs=[
            # main tile: (S, C, LT) lanes [j*LT, (j+1)*LT)
            pl.BlockSpec((stride, None, c, lt), lambda bi, j: (0, bi, 0, j)),
            # halo: next 128 lanes of the same phases (same buffer, 2nd binding)
            pl.BlockSpec((stride, None, c, _HALO),
                         lambda bi, j: (0, bi, 0, (j + 1) * tpb)),
            w2_spec,
            pl.BlockSpec((no, 1), lambda bi, j: (0, 0)),
        ],
        out_specs=pl.BlockSpec((None, no, lt), lambda bi, j: (bi, 0, j)),
        compiler_params=pltpu.CompilerParams(
            dimension_semantics=("parallel", "parallel")),
        cost_estimate=pl.CostEstimate(flops=int(flops), transcendentals=0,
                                      bytes_accessed=int(bytes_accessed)),
    )(x_ph, x_ph, w2, fb)

    # Output is already (B, NO, Lp); just drop the padded tail columns.
    return out[:, :, :l_out]


def _reference(x, dw_w, dw_b, pw_w, pw_b, *, kernel, stride, pad):
    """Pure-JAX reference matching PyTorch Conv1d semantics."""
    b, c, l = x.shape
    l_out = (l + 2 * pad - kernel) // stride + 1
    x_pad = jnp.pad(x, ((0, 0), (0, 0), (pad, pad)))
    dw = jnp.zeros((b, c, l_out), jnp.float32)
    for k in range(kernel):
        limit = k + stride * (l_out - 1) + 1
        xs = lax.slice(x_pad, (0, 0, k), (b, c, limit), (1, 1, stride))
        dw = dw + xs * dw_w[None, :, k:k + 1]
    dw = dw + dw_b[None, :, :]
    pw = jnp.einsum('oc,bcl->bol', pw_w, dw) + pw_b[None, :, :]
    return jnp.maximum(pw, 0.0)


def _run_case(seed, ni, no, kernel, stride, pad, B, L, storage_dtype, atol):
    key = jax.random.PRNGKey(seed)
    kx, k1, k2, k3, k4 = jax.random.split(key, 5)
    x = jax.random.normal(kx, (B, ni, L), dtype=jnp.float32)
    # Parameter shapes follow nn.Conv1d:
    #   depthwise: weight (ni, 1, K) -> (ni, K); bias (ni,) -> (ni, 1)
    #   pointwise: weight (no, ni, 1) -> (no, ni); bias (no,) -> (no, 1)
    dw_w = 0.1 * jax.random.normal(k1, (ni, kernel), dtype=jnp.float32)
    dw_b = 0.1 * jax.random.normal(k2, (ni, 1), dtype=jnp.float32)
    pw_w = 0.1 * jax.random.normal(k3, (no, ni), dtype=jnp.float32)
    pw_b = 0.1 * jax.random.normal(k4, (no, 1), dtype=jnp.float32)

    out = sepconv1d(x, dw_w, dw_b, pw_w, pw_b, kernel=kernel, stride=stride,
                    pad=pad, storage_dtype=storage_dtype)
    out = jax.block_until_ready(out)

    ref = _reference(x, dw_w, dw_b, pw_w, pw_b,
                     kernel=kernel, stride=stride, pad=pad)
    l_out = (L + 2 * pad - kernel) // stride + 1
    assert out.shape == (B, no, l_out), (out.shape, (B, no, l_out))
    err = float(jnp.max(jnp.abs(out - ref)))
    assert jnp.allclose(out, ref, atol=atol, rtol=atol), err


if __name__ == "__main__":
    # SepConv1d(ni=4, no=8, kernel=3, stride=1, pad=1) on (B=2, C=4, L=16); exact f32.
    _run_case(0, ni=4, no=8, kernel=3, stride=1, pad=1, B=2, L=16,
              storage_dtype=None, atol=1e-5)
    # Strided / larger-kernel config (multi-phase path); exact f32.
    _run_case(0, ni=4, no=8, kernel=5, stride=2, pad=2, B=2, L=16,
              storage_dtype=None, atol=1e-5)
    # Sublane-aligned channels (C=8): fused (NO, K*C) matmul path; exact f32.
    _run_case(1, ni=8, no=8, kernel=3, stride=1, pad=1, B=2, L=16,
              storage_dtype=None, atol=1e-5)
    # Multi-tile length (halo crosses into the next tile's real data); exact f32.
    _run_case(2, ni=4, no=8, kernel=3, stride=1, pad=1, B=2, L=300,
              storage_dtype=None, atol=1e-5)
    # Default bf16-in-HBM / bf16 MXU operands (f32 accumulate); looser tolerance.
    _run_case(3, ni=4, no=8, kernel=3, stride=1, pad=1, B=2, L=16,
              storage_dtype=jnp.bfloat16, atol=1e-2)
    print("KERNEL_OK")
</pallas_src>

<mosaic_0001>
module attributes {stable_mosaic.version = 11 : i64} {
  func.func @_sepconv1d_kernel(%arg0: i32, %arg1: i32, %arg2: memref<1x1x4x128xf32, #tpu.memory_space<vmem>>, %arg3: memref<1x1x4x128xf32, #tpu.memory_space<vmem>>, %arg4: memref<3x8x4xf32, #tpu.memory_space<vmem>>, %arg5: memref<8x1xf32, #tpu.memory_space<vmem>>, %arg6: memref<1x8x128xf32, #tpu.memory_space<vmem>>) attributes {dimension_semantics = [#tpu.dimension_semantics<parallel>, #tpu.dimension_semantics<parallel>], iteration_bounds = array<i64: 2, 1>, scalar_prefetch = 0 : i64, scratch_operands = 0 : i64, tpu.core_type = #tpu.core_type<tc>, window_params = [{transform_indices = @transform_0, window_bounds = array<i64: 1, 1, 4, 128>}, {transform_indices = @transform_1, window_bounds = array<i64: 1, 1, 4, 128>}, {pipeline_mode = #tpu.pipeline_mode<synchronous>, transform_indices = @transform_2, window_bounds = array<i64: 3, 8, 4>}, {pipeline_mode = #tpu.pipeline_mode<synchronous>, transform_indices = @transform_3, window_bounds = array<i64: 8, 1>}, {transform_indices = @transform_4, window_bounds = array<i64: 1, 8, 128>}]} {
    %c0 = arith.constant 0 : index
    %c0_0 = arith.constant 0 : index
    %c0_1 = arith.constant 0 : index
    %c0_2 = arith.constant 0 : index
    %0 = vector.load %arg2[%c0, %c0_0, %c0_1, %c0_2] : memref<1x1x4x128xf32, #tpu.memory_space<vmem>>, vector<1x1x4x128xf32>
    %1 = vector.shape_cast %0 : vector<1x1x4x128xf32> to vector<4x128xf32>
    %c0_3 = arith.constant 0 : index
    %c0_4 = arith.constant 0 : index
    %c0_5 = arith.constant 0 : index
    %c0_6 = arith.constant 0 : index
    %2 = vector.load %arg2[%c0_3, %c0_4, %c0_5, %c0_6] : memref<1x1x4x128xf32, #tpu.memory_space<vmem>>, vector<1x1x4x128xf32>
    %3 = vector.shape_cast %2 : vector<1x1x4x128xf32> to vector<4x128xf32>
    %c0_7 = arith.constant 0 : index
    %c0_8 = arith.constant 0 : index
    %c0_9 = arith.constant 0 : index
    %c0_10 = arith.constant 0 : index
    %4 = vector.load %arg3[%c0_7, %c0_8, %c0_9, %c0_10] : memref<1x1x4x128xf32, #tpu.memory_space<vmem>>, vector<1x1x4x128xf32>
    %5 = vector.shape_cast %4 : vector<1x1x4x128xf32> to vector<4x128xf32>
    %6 = tpu.concatenate %3, %5 in 1 : vector<4x128xf32>, vector<4x128xf32> -> vector<4x256xf32>
    %7 = vector.extract_strided_slice %6 {offsets = [0, 1], sizes = [4, 128], strides = [1, 1]} : vector<4x256xf32> to vector<4x128xf32>
    %8 = vector.extract_strided_slice %6 {offsets = [0, 2], sizes = [4, 128], strides = [1, 1]} : vector<4x256xf32> to vector<4x128xf32>
    %c0_11 = arith.constant 0 : index
    %c0_12 = arith.constant 0 : index
    %c0_13 = arith.constant 0 : index
    %9 = vector.load %arg4[%c0_11, %c0_12, %c0_13] : memref<3x8x4xf32, #tpu.memory_space<vmem>>, vector<1x8x4xf32>
    %10 = vector.shape_cast %9 : vector<1x8x4xf32> to vector<8x4xf32>
    %cst = arith.constant dense<0.000000e+00> : vector<8x128xf32>
    %11 = tpu.matmul %10, %1, %cst {dimension_numbers = #tpu.dot_dimension_numbers<[1], [0], [0], [1], [0, 0, 1, 1], [], []>} : vector<8x4xf32>, vector<4x128xf32>, vector<8x128xf32> -> vector<8x128xf32>
    %c1 = arith.constant 1 : index
    %c0_14 = arith.constant 0 : index
    %c0_15 = arith.constant 0 : index
    %12 = vector.load %arg4[%c1, %c0_14, %c0_15] : memref<3x8x4xf32, #tpu.memory_space<vmem>>, vector<1x8x4xf32>
    %13 = vector.shape_cast %12 : vector<1x8x4xf32> to vector<8x4xf32>
    %cst_16 = arith.constant dense<0.000000e+00> : vector<8x128xf32>
    %14 = tpu.matmul %13, %7, %cst_16 {dimension_numbers = #tpu.dot_dimension_numbers<[1], [0], [0], [1], [0, 0, 1, 1], [], []>} : vector<8x4xf32>, vector<4x128xf32>, vector<8x128xf32> -> vector<8x128xf32>
    %15 = arith.addf %11, %14 : vector<8x128xf32>
    %c2 = arith.constant 2 : index
    %c0_17 = arith.constant 0 : index
    %c0_18 = arith.constant 0 : index
    %16 = vector.load %arg4[%c2, %c0_17, %c0_18] : memref<3x8x4xf32, #tpu.memory_space<vmem>>, vector<1x8x4xf32>
    %17 = vector.shape_cast %16 : vector<1x8x4xf32> to vector<8x4xf32>
    %cst_19 = arith.constant dense<0.000000e+00> : vector<8x128xf32>
    %18 = tpu.matmul %17, %8, %cst_19 {dimension_numbers = #tpu.dot_dimension_numbers<[1], [0], [0], [1], [0, 0, 1, 1], [], []>} : vector<8x4xf32>, vector<4x128xf32>, vector<8x128xf32> -> vector<8x128xf32>
    %19 = arith.addf %15, %18 : vector<8x128xf32>
    %c0_20 = arith.constant 0 : index
    %c0_21 = arith.constant 0 : index
    %20 = vector.load %arg5[%c0_20, %c0_21] : memref<8x1xf32, #tpu.memory_space<vmem>>, vector<8x1xf32>
    %21 = vector.broadcast %20 : vector<8x1xf32> to vector<8x128xf32>
    %22 = arith.addf %19, %21 : vector<8x128xf32>
    %cst_22 = arith.constant 0.000000e+00 : f32
    %23 = vector.broadcast %cst_22 : f32 to vector<8x128xf32>
    %24 = arith.maximumf %22, %23 : vector<8x128xf32>
    %c0_23 = arith.constant 0 : index
    %c0_24 = arith.constant 0 : index
    %c0_25 = arith.constant 0 : index
    %25 = vector.load %arg6[%c0_23, %c0_24, %c0_25] : memref<1x8x128xf32, #tpu.memory_space<vmem>>, vector<1x8x128xf32>
    %26 = vector.shape_cast %25 : vector<1x8x128xf32> to vector<8x128xf32>
    %27 = vector.shape_cast %24 : vector<8x128xf32> to vector<1x8x128xf32>
    tpu.vector_store %arg6[%c0_23, %c0_24, %c0_25], %27 {strides = array<i32>} : memref<1x8x128xf32, #tpu.memory_space<vmem>>, vector<1x8x128xf32>,
    return
  }
  func.func @transform_0(%arg0: i32, %arg1: i32) -> (i32, i32, i32, i32) {
    %c0_i32 = arith.constant 0 : i32
    %c0_i32_0 = arith.constant 0 : i32
    %c0_i32_1 = arith.constant 0 : i32
    return %c0_i32, %arg0, %c0_i32_0, %arg1 : i32, i32, i32, i32
  }
  func.func @transform_1(%arg0: i32, %arg1: i32) -> (i32, i32, i32, i32) {
    %c1_i32 = arith.constant 1 : i32
    %0 = arith.addi %arg1, %c1_i32 : i32
    %c1_i32_0 = arith.constant 1 : i32
    %1 = arith.muli %0, %c1_i32_0 : i32
    %c0_i32 = arith.constant 0 : i32
    %c0_i32_1 = arith.constant 0 : i32
    %c0_i32_2 = arith.constant 0 : i32
    return %c0_i32, %arg0, %c0_i32_1, %1 : i32, i32, i32, i32
  }
  func.func @transform_2(%arg0: i32, %arg1: i32) -> (i32, i32, i32) {
    %c0_i32 = arith.constant 0 : i32
    %c0_i32_0 = arith.constant 0 : i32
    %c0_i32_1 = arith.constant 0 : i32
    %c0_i32_2 = arith.constant 0 : i32
    return %c0_i32, %c0_i32_0, %c0_i32_1 : i32, i32, i32
  }
  func.func @transform_3(%arg0: i32, %arg1: i32) -> (i32, i32) {
    %c0_i32 = arith.constant 0 : i32
    %c0_i32_0 = arith.constant 0 : i32
    %c0_i32_1 = arith.constant 0 : i32
    return %c0_i32, %c0_i32_0 : i32, i32
  }
  func.func @transform_4(%arg0: i32, %arg1: i32) -> (i32, i32, i32) {
    %c0_i32 = arith.constant 0 : i32
    %c0_i32_0 = arith.constant 0 : i32
    return %arg0, %c0_i32, %arg1 : i32, i32, i32
  }
}

</mosaic_0001>

<bundles_post_ra>
// kernel: tpu_custom_call.1
= control target key start
LH: loop header
LB: loop body
LE: loop exit
PB: predicated region body
PF: predicated region fallthrough
CT: control target
= control target key end

     0   :  { %9 = vsyncpa [#allocation3], 0  ;;  %s788_s0 = inlined_call_operand.vmem [shape: f32[1,2,4,256], index: 0, kind: input, shape index: {}]   ;;  %s789_s1 = inlined_call_operand.vmem [shape: f32[1,2,4,256], index: 1, kind: input, shape index: {}]   ;;  %s790_s2 = inlined_call_operand.vmem [shape: f32[3,8,4], index: 2, kind: input, shape index: {}]   ;;  %s791_s3 = inlined_call_operand.vmem [shape: f32[8,1], index: 3, kind: input, shape index: {}]   ;;  %s792_s4 = inlined_call_operand.hbm [shape: f32[2,8,128], index: 4, kind: output, shape index: {}]  }
   0x1   :  { %11 = vsyncpa [#allocation3 + $0x1], 0  ;;  %s670_s15 = smov 0   ;;  %s672_s16 = smov 0  }
   0x2   :  { %s674_s17 = smov 0   ;;  %s676_s18 = smov 0  }
   0x3   :  { %s678_s19 = smov 0   ;;  %s680_s20 = smov 0  }
   0x4 LB: > { %s476_s21 = sadd.s32 4294967295, %s640_s20   ;;  %s477_s22 = sadd.s32 4294967294, %s640_s20   ;;  %s640_s20 = sphi %s680_s20, %s17_s20   ;;  %s636_s19 = sphi %s678_s19, %s799_s19   ;;  %s632_s18 = sphi %s676_s18, %s798_s18   ;;  %s628_s17 = sphi %s674_s17, %s797_s17   ;;  %s624_s16 = sphi %s672_s16, %s796_s16   ;;  %s620_s15 = sphi %s670_s15, %s795_s15  }
   0x5   : > { %s29_s23 = sadd.s32 1, %s636_s19  ;;  %s138_s24 = sadd.s32 1, %s628_s17 }
   0x6   : > { %p31_p0 = scmp.ge.s32.totalorder %s29_s23, 2  ;;  %p148_p1 = scmp.ne.s32.totalorder %s628_s17, %s624_s16 }
   0x7   : > { %p149_p2 = scmp.eq.s32.totalorder %s476_s21, 1  ;;  %p154_p3 = scmp.ne.s32.totalorder %s624_s16, %s620_s15 }
   0x8   : > { %s801_s23 = smov (%p31_p0, %s29_s23), 0  ;;  %p155_p5 = scmp.eq.s32.totalorder %s477_s22, 1 }
   0x9   : > { %p710_p4 = por %p149_p2, %p148_p1  ;;  %s133_s26 = ssub.s32 %s636_s19, %s801_s23 }
   0xa   : > { %p480_p6 = scmp.ge.s32.totalorder %s640_s20, 1  ;;  %p136_p7 = scmp.eq.s32.totalorder %s133_s26, 0 }
   0xb   : > { %p717_p8 = por %p155_p5, %p154_p3  ;;  %p203_p9 = scmp.lt.s32.totalorder %s640_s20, 3 }
   0xc   : > { %s723_s28 = scalar_select %p136_p7, %s628_s17, %s138_s24  }
   0xd   : > { %p204_p10 = pnand %p480_p6, %p203_p9 }
   0xe   : > { %p241_p11 = scmp.lt.s32.totalorder (!%p204_p10), %s632_s18, 1  ;;  %s642_s9 = smov (!%p204_p10), 127  }
   0xf   : > { %207 = sbr.rel (%p204_p10) target bundleno = 291 (0x123), region = 36  ;;  %s643_s10 = smov (!%p204_p10), 126  }
  0x10   : > { %s238_s6 = sand.u32 (!%p204_p10), 1, %s624_s16  }
  0x11   : > { %s368_s21 = scalar_lea.sflag (!%p204_p10), [#allocation3], %s238_s6 }
  0x14   : > { %s242_s29 = scalar_select %p241_p11, %s632_s18, 1  ;;  %vm276_vm0 = vcmask 1043456   ;;  %vm272_vm1 = vcmask 31744   ;;  %v261_v2 = vld [vmem:[%s790_s2] sm:$0xff]  ;;  %v644_v4 = vmov 0   ;;  %vm270_vm2 = vcmask 1039360  }
  0x15   : > { %v358_v3 = vld [vmem:[%s791_s3] sm:$0xff]  ;;  %560 = vset.pattern.permute.xlu2 %v644_v4  ;;  %561 = vset.pattern.permute.xlu0 %v644_v4  ;;  %vm330_vm3 = vcmask 1031168   ;;  %v491_v9 = vld [vmem:[%s790_s2 + $0x10] sm:$0xff]  ;;  %v486_v10 = vld [vmem:[%s790_s2 + $0x8] sm:$0xff] }
  0x16   : > { %s498_s30 = sshll.u32 %s242_s29, 3  ;;  %361 = vperm.xlu2 %560, %v358_v3   ;;  %s582_s29 = scalar_lea.hbm %s792_s4, 16 }
  0x17   : > { %s248_s7 = scalar_lea.vmem %s788_s0, %s498_s30  ;;  %s500_s8 = sadd.s32 4, %s498_s30 }
  0x18   : > { %v259_v0 = vld [vmem:[%s248_s7] sm:$0xf]  ;;  %s257_s13 = scalar_lea.vmem %s789_s1, %s500_s8  ;;  %s481_s7 = sshll.u32 %s238_s6, 3 }
  0x19   : > { %266 = vrot.lane.b32.xlu1 %v259_v0, %s642_s9  ;;  %326 = vrot.lane.b32.xlu0 %v259_v0, %s643_s10  ;;  %v260_v1 = vld [vmem:[%s257_s13] sm:$0xf]  ;;  %s495_s8 = sshll.u32 %s632_s18, 3  ;;  %s240_s12 = scalar_lea.vmem [#allocation2], %s481_s7 }
  0x1a   : > { %489 = vmatpush.msk.msra.mxu1 %vm276_vm0, %v259_v0  ;;  %s379_s11 = scalar_lea.hbm %s792_s4, %s495_s8  ;;  %s381_s13 = sshll.u32 %s240_s12, 4  ;;  %s382_s13 = int_to_ptr.vmem [resolvable:$true] %s381_s13 }
  0x1b   : > { %490 = vmatmul.msk.f32.vlgmr.msra.gmra.mxu1 %vm272_vm1, %v261_v2  ;;  %s383_s14 = sshll.u32 %s379_s11, 4  ;;  %s384_s14 = int_to_ptr.hbm [resolvable:$true] %s383_s14 }
  0x1c   : > { %s576_s22 = sshra.s32 %s384_s14, 4  ;;  %s577_s22 = int_to_ptr.hbm [resolvable:$true] %s576_s22 }
  0x1d   : > { %s578_s18 = scalar_lea.hbm %s577_s22, 8  ;;  %p583_p1 = scmp.lt.s32.totalorder %s577_s22, %s792_s4 }
  0x1e   : > { %p579_p12 = scmp.ne.s32.totalorder %s577_s22, %s578_s18  ;;  %p584_p2 = scmp.lt.s32.totalorder %s582_s29, %s578_s18 }
  0x20   : > { %p580_p13 = pnand %p579_p12, %p710_p4  ;;  %p585_p3 = por %p584_p2, %p583_p1 }
  0x21   : > { %268 = vrot.lane.b32.xlu1 %v260_v1, %s642_s9  ;;  %328 = vrot.lane.b32.xlu0 %v260_v1, %s643_s10 }
  0x22   : > { %p581_p0 = pneg %p580_p13 }
  0x24   : > { %p586_p5 = pnand %p585_p3, %p581_p0 }
  0x70   : > { %v362_v17 = vpop.permute.xlu2 %361 }
  0x8b   : > { %v267_v5 = vpop.permute.xlu1 %266  ;;  %v327_v6 = vpop.permute.xlu0 %326 }
  0x93   : > { %v269_v7 = vpop.permute.xlu1 %268  ;;  %v329_v8 = vpop.permute.xlu0 %328 }
  0x94   : > { %v271_v11 = vsel %vm270_vm2, %v267_v5, %v269_v7  ;;  %v331_v12 = vsel %vm330_vm3, %v327_v6, %v329_v8 }
  0x95   : > { %487 = vmatpush.msk.msra.mxu0 %vm276_vm0, %v271_v11  ;;  %492 = vmatpush.msk.msra.mxu2 %vm276_vm0, %v331_v12 }
  0x96   : > { %493 = vmatmul.msk.f32.vlgmr.msra.gmra.mxu2 %vm272_vm1, %v491_v9  ;;  %488 = vmatmul.msk.f32.vlgmr.msra.gmra.mxu0 %vm272_vm1, %v486_v10 }
  0x98   : > { %v321_v14 = vpop.f32.mrf.mxu1 }
 0x113   : > { %v296_v13 = vpop.f32.mrf.mxu0 }
 0x114   : > { %v322_v15 = vadd.f32 %v321_v14, %v296_v13 }
 0x119   : > { %v354_v16 = vpop.f32.mrf.mxu2 }
 0x11a   : > { %v357_v18 = vadd.f32 %v354_v16, %v322_v15 }
 0x11c   : > { %v364_v19 = vadd.f32 %v362_v17, %v357_v18 }
 0x11e   : > { %v365_v20 = vmax.f32 %v364_v19, 0.0 }
 0x120   : > { %366 = vst [vmem:[%s240_s12] sm:$0xff] %v365_v20 }
 0x121   : > { %589 = shalt.err (!%p586_p5)
}
 0x122   : > { %502 = dma.vmem_to_hbm [thread:$0]  (%p710_p4), %s382_s13, 128, %s384_s14, %s368_s21  }
 0x123 PF: > { %p508_p6 = scmp.ge.s32.totalorder %s640_s20, 2  ;;  %s395_s6 = sand.u32 1, %s620_s15  }
 0x124   : > { %s396_s7 = scalar_lea.sflag [#allocation3], %s395_s6 }
 0x125   : > { %p505_p7 = pnand %p508_p6, %p717_p8 }
 0x127   : > { %p506_p9 = pneg %p505_p7 }
 0x129   : > { %615 = dma.done.wait (%p506_p9), %s396_s7, 128  }
 0x12a   : > { %617 = vsyncadd (%p506_p9), %s396_s7, 4294967168  ;;  %s17_s20 = sadd.s32 1, %s640_s20   ;;  %s795_s15 = smov %s624_s16 }
 0x12b   : > { %p14_p10 = scmp.ge.s32.totalorder %s17_s20, 4   ;;  %s796_s16 = smov %s628_s17 }
 0x12c   : > { %s797_s17 = smov %s723_s28  ;;  %s798_s18 = smov %s636_s19 }
 0x12d   : > { %s799_s19 = smov %s801_s23  ;;  %16 = sbr.rel (!%p14_p10) target bundleno = 4 (0x4), region = 76 }
 0x132   :  { %402 = vsyncpa [#allocation3], 1 }
 0x133   :  { %404 = vsyncpa [#allocation3 + $0x1], 1 }

</bundles_post_ra>
